<compile_context>
chip_gen: v6e
topology: v6e:2x2x1
jax: 0.10.0
libtpu: 0.0.40
codegen_flags: <defaults>
</compile_context>

<pallas_src>
import functools

import jax
import jax.numpy as jnp
from jax.experimental import pallas as pl
from jax.experimental.pallas import tpu as pltpu

LANE = 128
K_PAD = 32          # stem contraction dim Cin*3*3 = 27, padded only to 32
C_STEM_PAD = 128    # stem output channels 32, padded to one lane group
FEAT_PAD = 1024     # backbone feature dim 1000, padded to a lane multiple


def _round_up(x, m):
    return ((x + m - 1) // m) * m


# ---------------------------------------------------------------------------
# Kernel 1: stem conv-as-matmul + swish + global average pool
# ---------------------------------------------------------------------------
def _stem_pool_kernel(p_ref, ws_ref, bs_ref, o_ref, *, hw_valid, n_pad_rows):
    """Grid = (batch tiles, spatial tiles).  o_ref (tb, Cp) is the resident f32
    pool accumulator (same output block across the 'arbitrary' spatial axis)."""
    t = pl.program_id(1)

    @pl.when(t == 0)
    def _():
        o_ref[...] = jnp.zeros_like(o_ref)

    tb, t_hw, kp = p_ref.shape
    # Fold the batch tile into M: one fat (tb*t_hw, 32) @ (32, 128) MXU matmul.
    x = jnp.dot(p_ref[...].reshape(tb * t_hw, kp), ws_ref[...],
                preferred_element_type=jnp.float32)              # (tb*t_hw, Cp) f32
    # bias + swish in bf16 (halves EUP/VPU slot work on v6e/v7x; correct on v5e).
    x = x.astype(jnp.bfloat16) + bs_ref[...]
    x = x * jax.nn.sigmoid(x)
    # per-batch spatial partial sum, accumulated in f32.
    o_ref[...] += jnp.sum(x.reshape(tb, t_hw, -1).astype(jnp.float32), axis=1)

    @pl.when(t == pl.num_programs(1) - 1)
    def _():
        acc = o_ref[...]
        if n_pad_rows > 0:
            # zero-padded spatial rows each contribute exactly swish(b_stem);
            # remove them once here instead of masking every tile.
            zb = bs_ref[...]
            pad_row = (zb * jax.nn.sigmoid(zb)).astype(jnp.float32)
            acc = acc - jnp.float32(n_pad_rows) * pad_row
        o_ref[...] = acc * (1.0 / hw_valid)


def stem_pool(patches, w_stem, b_stem):
    """patches: (B, HW, K_PAD) bf16 -> pooled (B, C_STEM_PAD) f32."""
    B, HW, Kp = patches.shape
    Cp = w_stem.shape[1]

    # Fat spatial tiles; rounded to 16 rows for bf16 sublane packing.
    t_hw = min(2048, _round_up(HW, 16))
    HWp = _round_up(HW, t_hw)
    if B <= 8:
        tb, Bp = B, B
    else:
        tb, Bp = 8, _round_up(B, 8)

    if (Bp, HWp) != (B, HW):
        patches = jnp.pad(patches, ((0, Bp - B), (0, HWp - HW), (0, 0)))

    kernel = functools.partial(_stem_pool_kernel, hw_valid=HW, n_pad_rows=HWp - HW)

    pooled = pl.pallas_call(
        kernel,
        out_shape=jax.ShapeDtypeStruct((Bp, Cp), jnp.float32),
        grid=(Bp // tb, HWp // t_hw),
        in_specs=[
            pl.BlockSpec((tb, t_hw, Kp), lambda b, t: (b, t, 0)),   # patches (bf16)
            pl.BlockSpec((Kp, Cp), lambda b, t: (0, 0)),            # w_stem  (bf16)
            pl.BlockSpec((1, Cp), lambda b, t: (0, 0)),             # b_stem  (bf16)
        ],
        out_specs=pl.BlockSpec((tb, Cp), lambda b, t: (b, 0)),
        compiler_params=pltpu.CompilerParams(
            dimension_semantics=("parallel", "arbitrary"),
            vmem_limit_bytes=32 * 1024 * 1024,
        ),
    )(patches, w_stem, b_stem)
    return pooled[:B]


# ---------------------------------------------------------------------------
# Kernel 2: head — FC(128 -> 1024 padded) -> classifier -> sigmoid, batched over B
# ---------------------------------------------------------------------------
def _head_kernel(pooled_ref, wf_ref, bf_ref, wc_ref, bc_ref, o_ref):
    p = pooled_ref[...].astype(jnp.bfloat16)                              # (B, Cp)
    feats = jnp.dot(p, wf_ref[...], preferred_element_type=jnp.float32)   # (B, 1024)
    feats = (feats + bf_ref[...]).astype(jnp.bfloat16)
    logits = jnp.dot(feats, wc_ref[...],
                     preferred_element_type=jnp.float32) + bc_ref[...]    # (B, NC)
    o_ref[...] = jax.nn.sigmoid(logits)


def head(pooled, w_fc, b_fc, w_cls, b_cls):
    B = pooled.shape[0]
    NC = w_cls.shape[1]
    return pl.pallas_call(
        _head_kernel,
        out_shape=jax.ShapeDtypeStruct((B, NC), jnp.float32),
    )(pooled, w_fc, b_fc, w_cls, b_cls)


# ---------------------------------------------------------------------------
# JAX glue
# ---------------------------------------------------------------------------
def im2col(x, kh, kw, stride, pad, k_pad_to):
    """NCHW -> (B, Ho*Wo, k_pad_to) patch matrix (feature order: Cin, kh, kw).
    Output dtype follows x; cast x to bf16 before calling to avoid an extra pass."""
    B, C, H, W = x.shape
    xp = jnp.pad(x, ((0, 0), (0, 0), (pad, pad), (pad, pad)))
    Ho = (H + 2 * pad - kh) // stride + 1
    Wo = (W + 2 * pad - kw) // stride + 1
    cols = []
    for i in range(kh):
        for j in range(kw):
            cols.append(
                xp[:, :, i: i + stride * Ho: stride, j: j + stride * Wo: stride])
    pm = jnp.stack(cols, axis=2)                     # (B, C, kh*kw, Ho, Wo)
    pm = pm.reshape(B, C * kh * kw, Ho * Wo)
    if k_pad_to > C * kh * kw:                       # 27 -> 32 only; fuses into transpose
        pm = jnp.pad(pm, ((0, 0), (0, k_pad_to - C * kh * kw), (0, 0)))
    pm = pm.transpose(0, 2, 1)                       # (B, Ho*Wo, k_pad_to)
    return pm, Ho, Wo


def init_params(key, num_classes, cin=3, c_stem=32, feat_dim=1000):
    ks = jax.random.split(key, 6)
    scale = 0.02
    k_raw = cin * 9

    # stem conv weight: PyTorch (Cout, Cin, 3, 3) -> matmul (Cin*9, Cout);
    # K padded 27->32 (NOT 128), Cout padded 32->128; stored bf16 for the MXU.
    w_stem = scale * jax.random.normal(ks[0], (k_raw, c_stem), jnp.float32)
    w_stem = jnp.pad(w_stem, ((0, K_PAD - k_raw), (0, C_STEM_PAD - c_stem)))
    w_stem = w_stem.astype(jnp.bfloat16)

    b_stem = scale * jax.random.normal(ks[1], (1, c_stem), jnp.float32)
    b_stem = jnp.pad(b_stem, ((0, 0), (0, C_STEM_PAD - c_stem))).astype(jnp.bfloat16)

    # backbone final FC -> 1000 features; feat dim padded 1000->1024, bf16 weights.
    w_fc = scale * jax.random.normal(ks[2], (c_stem, feat_dim), jnp.float32)
    w_fc = jnp.pad(w_fc, ((0, C_STEM_PAD - c_stem), (0, FEAT_PAD - feat_dim)))
    w_fc = w_fc.astype(jnp.bfloat16)
    b_fc = jnp.pad(scale * jax.random.normal(ks[3], (1, feat_dim), jnp.float32),
                   ((0, 0), (0, FEAT_PAD - feat_dim)))

    # classifier = nn.Linear(1000, num_classes); padded feature rows are zero.
    w_cls = scale * jax.random.normal(ks[4], (feat_dim, num_classes), jnp.float32)
    w_cls = jnp.pad(w_cls, ((0, FEAT_PAD - feat_dim), (0, 0))).astype(jnp.bfloat16)
    b_cls = scale * jax.random.normal(ks[5], (1, num_classes), jnp.float32)

    return {"w_stem": w_stem, "b_stem": b_stem,
            "w_fc": w_fc, "b_fc": b_fc, "w_cls": w_cls, "b_cls": b_cls}


@jax.jit
def base_model_forward(x, params):
    # bf16 cast BEFORE im2col: patches are produced directly in bf16, no second
    # pad/cast rewrite of the dominant HBM tensor.
    xb = x.astype(jnp.bfloat16)
    patches, _, _ = im2col(xb, 3, 3, stride=2, pad=1, k_pad_to=K_PAD)
    pooled = stem_pool(patches, params["w_stem"], params["b_stem"])   # (B, 128) f32
    out = head(pooled, params["w_fc"], params["b_fc"],
               params["w_cls"], params["b_cls"])                      # (B, NC) f32
    return out


if __name__ == "__main__":
    key = jax.random.PRNGKey(0)
    k_x, k_p = jax.random.split(key)

    B, C, H, W = 2, 3, 16, 16
    num_classes = 10

    x = jax.random.normal(k_x, (B, C, H, W), dtype=jnp.float32)
    params = init_params(k_p, num_classes)

    out = base_model_forward(x, params)
    out = jax.block_until_ready(out)

    assert out.shape == (B, num_classes), out.shape
    assert bool(jnp.all((out >= 0.0) & (out <= 1.0))), "sigmoid range violated"
    print("KERNEL_OK")
</pallas_src>

<mosaic_0001>
module attributes {stable_mosaic.version = 11 : i64} {
  func.func @_stem_pool_kernel(%arg0: i32, %arg1: i32, %arg2: memref<2x64x32xbf16, #tpu.memory_space<vmem>>, %arg3: memref<32x128xbf16, #tpu.memory_space<vmem>>, %arg4: memref<1x128xbf16, #tpu.memory_space<vmem>>, %arg5: memref<2x128xf32, #tpu.memory_space<vmem>>) attributes {dimension_semantics = [#tpu.dimension_semantics<parallel>, #tpu.dimension_semantics<arbitrary>], iteration_bounds = array<i64: 1, 1>, scalar_prefetch = 0 : i64, scratch_operands = 0 : i64, tpu.core_type = #tpu.core_type<tc>, window_params = [{transform_indices = @transform_0, window_bounds = array<i64: 2, 64, 32>}, {pipeline_mode = #tpu.pipeline_mode<synchronous>, transform_indices = @transform_1, window_bounds = array<i64: 32, 128>}, {pipeline_mode = #tpu.pipeline_mode<synchronous>, transform_indices = @transform_2, window_bounds = array<i64: 1, 128>}, {transform_indices = @transform_3, window_bounds = array<i64: 2, 128>}]} {
    %c0_i32 = arith.constant 0 : i32
    %0 = arith.cmpi eq, %arg1, %c0_i32 : i32
    %1 = arith.extui %0 : i1 to i32
    %c0_i32_0 = arith.constant 0 : i32
    %2 = arith.cmpi ne, %1, %c0_i32_0 : i32
    scf.if %2 {
      %cst_15 = arith.constant 0.000000e+00 : f32
      %26 = vector.broadcast %cst_15 : f32 to vector<2x128xf32>
      %c0_16 = arith.constant 0 : index
      %c0_17 = arith.constant 0 : index
      %27 = vector.load %arg5[%c0_16, %c0_17] : memref<2x128xf32, #tpu.memory_space<vmem>>, vector<2x128xf32>
      tpu.vector_store %arg5[%c0_16, %c0_17], %26 {strides = array<i32>} : memref<2x128xf32, #tpu.memory_space<vmem>>, vector<2x128xf32>,
    } else {
    }
    %c0 = arith.constant 0 : index
    %c0_1 = arith.constant 0 : index
    %c0_2 = arith.constant 0 : index
    %3 = vector.load %arg2[%c0, %c0_1, %c0_2] : memref<2x64x32xbf16, #tpu.memory_space<vmem>>, vector<2x64x32xbf16>
    %4 = vector.shape_cast %3 : vector<2x64x32xbf16> to vector<128x32xbf16>
    %c0_3 = arith.constant 0 : index
    %c0_4 = arith.constant 0 : index
    %5 = vector.load %arg3[%c0_3, %c0_4] : memref<32x128xbf16, #tpu.memory_space<vmem>>, vector<32x128xbf16>
    %cst = arith.constant dense<0.000000e+00> : vector<128x128xf32>
    %6 = tpu.matmul %4, %5, %cst {dimension_numbers = #tpu.dot_dimension_numbers<[1], [0], [0], [1], [0, 0, 1, 1], [], []>} : vector<128x32xbf16>, vector<32x128xbf16>, vector<128x128xf32> -> vector<128x128xf32>
    %7 = arith.truncf %6 : vector<128x128xf32> to vector<128x128xbf16>
    %c0_5 = arith.constant 0 : index
    %c0_6 = arith.constant 0 : index
    %8 = vector.load %arg4[%c0_5, %c0_6] : memref<1x128xbf16, #tpu.memory_space<vmem>>, vector<1x128xbf16>
    %9 = vector.broadcast %8 : vector<1x128xbf16> to vector<128x128xbf16>
    %10 = arith.addf %7, %9 : vector<128x128xbf16>
    %11 = arith.negf %10 : vector<128x128xbf16>
    %12 = math.exp %11 : vector<128x128xbf16>
    %cst_7 = arith.constant 1.000000e+00 : bf16
    %13 = vector.broadcast %cst_7 : bf16 to vector<128x128xbf16>
    %14 = arith.addf %13, %12 : vector<128x128xbf16>
    %15 = arith.divf %13, %14 : vector<128x128xbf16>
    %16 = arith.mulf %10, %15 : vector<128x128xbf16>
    %c0_8 = arith.constant 0 : index
    %c0_9 = arith.constant 0 : index
    %17 = vector.load %arg5[%c0_8, %c0_9] : memref<2x128xf32, #tpu.memory_space<vmem>>, vector<2x128xf32>
    %18 = vector.shape_cast %16 : vector<128x128xbf16> to vector<2x64x128xbf16>
    %19 = arith.extf %18 : vector<2x64x128xbf16> to vector<2x64x128xf32>
    %cst_10 = arith.constant dense<0.000000e+00> : vector<2x128xf32>
    %20 = vector.multi_reduction <add>, %19, %cst_10 [1] : vector<2x64x128xf32> to vector<2x128xf32>
    %21 = arith.addf %17, %20 : vector<2x128xf32>
    %c0_11 = arith.constant 0 : index
    %c0_12 = arith.constant 0 : index
    %22 = vector.load %arg5[%c0_11, %c0_12] : memref<2x128xf32, #tpu.memory_space<vmem>>, vector<2x128xf32>
    tpu.vector_store %arg5[%c0_11, %c0_12], %21 {strides = array<i32>} : memref<2x128xf32, #tpu.memory_space<vmem>>, vector<2x128xf32>,
    %c0_i32_13 = arith.constant 0 : i32
    %23 = arith.cmpi eq, %arg1, %c0_i32_13 : i32
    %24 = arith.extui %23 : i1 to i32
    %c0_i32_14 = arith.constant 0 : i32
    %25 = arith.cmpi ne, %24, %c0_i32_14 : i32
    scf.if %25 {
      %c0_15 = arith.constant 0 : index
      %c0_16 = arith.constant 0 : index
      %26 = vector.load %arg5[%c0_15, %c0_16] : memref<2x128xf32, #tpu.memory_space<vmem>>, vector<2x128xf32>
      %cst_17 = arith.constant 1.562500e-02 : f32
      %27 = vector.broadcast %cst_17 : f32 to vector<2x128xf32>
      %28 = arith.mulf %26, %27 : vector<2x128xf32>
      %c0_18 = arith.constant 0 : index
      %c0_19 = arith.constant 0 : index
      %29 = vector.load %arg5[%c0_18, %c0_19] : memref<2x128xf32, #tpu.memory_space<vmem>>, vector<2x128xf32>
      tpu.vector_store %arg5[%c0_18, %c0_19], %28 {strides = array<i32>} : memref<2x128xf32, #tpu.memory_space<vmem>>, vector<2x128xf32>,
    } else {
    }
    return
  }
  func.func @transform_0(%arg0: i32, %arg1: i32) -> (i32, i32, i32) {
    %c0_i32 = arith.constant 0 : i32
    %c0_i32_0 = arith.constant 0 : i32
    return %arg0, %arg1, %c0_i32 : i32, i32, i32
  }
  func.func @transform_1(%arg0: i32, %arg1: i32) -> (i32, i32) {
    %c0_i32 = arith.constant 0 : i32
    %c0_i32_0 = arith.constant 0 : i32
    %c0_i32_1 = arith.constant 0 : i32
    return %c0_i32, %c0_i32_0 : i32, i32
  }
  func.func @transform_2(%arg0: i32, %arg1: i32) -> (i32, i32) {
    %c0_i32 = arith.constant 0 : i32
    %c0_i32_0 = arith.constant 0 : i32
    %c0_i32_1 = arith.constant 0 : i32
    return %c0_i32, %c0_i32_0 : i32, i32
  }
  func.func @transform_3(%arg0: i32, %arg1: i32) -> (i32, i32) {
    %c0_i32 = arith.constant 0 : i32
    %c0_i32_0 = arith.constant 0 : i32
    return %arg0, %c0_i32 : i32, i32
  }
}

module attributes {stable_mosaic.version = 11 : i64} {
  func.func @_head_kernel(%arg0: memref<2x128xf32, #tpu.memory_space<vmem>>, %arg1: memref<128x1024xbf16, #tpu.memory_space<vmem>>, %arg2: memref<1x1024xf32, #tpu.memory_space<vmem>>, %arg3: memref<1024x10xbf16, #tpu.memory_space<vmem>>, %arg4: memref<1x10xf32, #tpu.memory_space<vmem>>, %arg5: memref<2x10xf32, #tpu.memory_space<vmem>>) attributes {dimension_semantics = [], scalar_prefetch = 0 : i64, scratch_operands = 0 : i64, tpu.core_type = #tpu.core_type<tc>} {
    %c0 = arith.constant 0 : index
    %c0_0 = arith.constant 0 : index
    %0 = vector.load %arg0[%c0, %c0_0] : memref<2x128xf32, #tpu.memory_space<vmem>>, vector<2x128xf32>
    %1 = arith.truncf %0 : vector<2x128xf32> to vector<2x128xbf16>
    %c0_1 = arith.constant 0 : index
    %c0_2 = arith.constant 0 : index
    %2 = vector.load %arg1[%c0_1, %c0_2] : memref<128x1024xbf16, #tpu.memory_space<vmem>>, vector<128x1024xbf16>
    %cst = arith.constant dense<0.000000e+00> : vector<2x1024xf32>
    %3 = tpu.matmul %1, %2, %cst {dimension_numbers = #tpu.dot_dimension_numbers<[1], [0], [0], [1], [0, 0, 1, 1], [], []>} : vector<2x128xbf16>, vector<128x1024xbf16>, vector<2x1024xf32> -> vector<2x1024xf32>
    %c0_3 = arith.constant 0 : index
    %c0_4 = arith.constant 0 : index
    %4 = vector.load %arg2[%c0_3, %c0_4] : memref<1x1024xf32, #tpu.memory_space<vmem>>, vector<1x1024xf32>
    %5 = vector.broadcast %4 : vector<1x1024xf32> to vector<2x1024xf32>
    %6 = arith.addf %3, %5 : vector<2x1024xf32>
    %7 = arith.truncf %6 : vector<2x1024xf32> to vector<2x1024xbf16>
    %c0_5 = arith.constant 0 : index
    %c0_6 = arith.constant 0 : index
    %8 = vector.load %arg3[%c0_5, %c0_6] : memref<1024x10xbf16, #tpu.memory_space<vmem>>, vector<1024x10xbf16>
    %cst_7 = arith.constant dense<0.000000e+00> : vector<2x10xf32>
    %9 = tpu.matmul %7, %8, %cst_7 {dimension_numbers = #tpu.dot_dimension_numbers<[1], [0], [0], [1], [0, 0, 1, 1], [], []>} : vector<2x1024xbf16>, vector<1024x10xbf16>, vector<2x10xf32> -> vector<2x10xf32>
    %c0_8 = arith.constant 0 : index
    %c0_9 = arith.constant 0 : index
    %10 = vector.load %arg4[%c0_8, %c0_9] : memref<1x10xf32, #tpu.memory_space<vmem>>, vector<1x10xf32>
    %11 = vector.broadcast %10 : vector<1x10xf32> to vector<2x10xf32>
    %12 = arith.addf %9, %11 : vector<2x10xf32>
    %13 = arith.negf %12 : vector<2x10xf32>
    %14 = math.exp %13 : vector<2x10xf32>
    %cst_10 = arith.constant 1.000000e+00 : f32
    %15 = vector.broadcast %cst_10 : f32 to vector<2x10xf32>
    %16 = arith.addf %15, %14 : vector<2x10xf32>
    %17 = arith.divf %15, %16 : vector<2x10xf32>
    %c0_11 = arith.constant 0 : index
    %c0_12 = arith.constant 0 : index
    %18 = vector.load %arg5[%c0_11, %c0_12] : memref<2x10xf32, #tpu.memory_space<vmem>>, vector<2x10xf32>
    tpu.vector_store %arg5[%c0_11, %c0_12], %17 {strides = array<i32>} : memref<2x10xf32, #tpu.memory_space<vmem>>, vector<2x10xf32>,
    return
  }
}

</mosaic_0001>

<bundles_post_ra>
// kernel: base_model_forward.2
= control target key start
LH: loop header
LB: loop body
LE: loop exit
PB: predicated region body
PF: predicated region fallthrough
CT: control target
= control target key end

     0   :  { %vm93_vm0 = vcmask 261120   ;;  %v466_v10 = vmov 0.0   ;;  %v227_v11 = vlaneseq  ;;  %vm348_vm1 = vcmask 1041409   ;;  %s575_s1 = inlined_call_operand.vmem [shape: bf16[32,128], index: 1, kind: input, shape index: {}]   ;;  %s576_s0 = inlined_call_operand.vmem [shape: bf16[2,64,32], index: 0, kind: input, shape index: {}]   ;;  %s577_s3 = inlined_call_operand.vmem [shape: f32[2,128], index: 3, kind: output, shape index: {}]   ;;  %s578_s2 = inlined_call_operand.vmem [shape: bf16[1,128], index: 2, kind: input, shape index: {}]  }
   0x1   :  { %v424_v0 = vld [vmem:[%s575_s1 + $0x8] sm:$0xff]   ;;  %v425_v1 = vld [vmem:[%s575_s1] sm:$0xff]   ;;  %v430_v6 = vld [vmem:[%s576_s0 + $0x10] sm:$0xff]   ;;  %20 = vst [vmem:[%s577_s3] sm:$0x3] %v466_v10 }
   0x2   :  { %399 = vmatprep.subr.bf16.mxu0 %v424_v0  ;;  %419 = vmatprep.subr.bf16.mxu1 %v424_v0  ;;  %v426_v2 = vld [vmem:[%s576_s0] sm:$0xff]   ;;  %v428_v4 = vld [vmem:[%s576_s0 + $0x8] sm:$0xff]   ;;  %v431_v7 = vld [vmem:[%s576_s0 + $0x30] sm:$0xff]   ;;  %v228_v12 = vshrl.u32 %v227_v11, 7 }
   0x3   :  { %400 = vmatpush3.bf16.msra.mxu0 %v424_v0  ;;  %421 = vmatpush3.bf16.msra.mxu1 %v424_v0  ;;  %v427_v3 = vld [vmem:[%s576_s0 + $0x20] sm:$0xff]   ;;  %v429_v5 = vld [vmem:[%s576_s0 + $0x28] sm:$0xff]   ;;  %v432_v8 = vld [vmem:[%s576_s0 + $0x18] sm:$0xff]  }
   0x4   :  { %401 = vmatprep.subr.bf16.mxu0 %v425_v1  ;;  %420 = vmatprep.subr.bf16.mxu1 %v425_v1  ;;  %v433_v9 = vld [vmem:[%s576_s0 + $0x38] sm:$0xff]   ;;  %v223_v13 = vld [vmem:[%s578_s2] sm:$0x1]  ;;  %v229_v15 = vsub.s32 0, %v228_v12 }
   0x5   :  { %403 = vmatprep.mubr.msk.bf16.mxu0 %vm93_vm0, %v426_v2  ;;  %411 = vmatprep.mubr.msk.bf16.mxu1 %vm93_vm0, %v427_v3  ;;  %v225_v14 = vpack.i.b16 %v223_v13, %v223_v13 }
   0x7   :  { %402 = vmatpush3.bf16.msra.mxu0 %v425_v1  ;;  %422 = vmatpush3.bf16.msra.mxu1 %v425_v1  ;;  %v230_v20 = vrot.slane %v225_v14, %v229_v15 }
   0xa   :  { %404 = vmatmul.mubr.msk.bf16.vlgmr.msra.gmra.mxu0 %vm93_vm0, %v428_v4  ;;  %412 = vmatmul.mubr.msk.bf16.vlgmr.msra.gmra.mxu1 %vm93_vm0, %v429_v5 }
   0xb   :  { %407 = vmatprep.mubr.msk.bf16.mxu0 %vm93_vm0, %v430_v6  ;;  %415 = vmatprep.mubr.msk.bf16.mxu1 %vm93_vm0, %v431_v7 }
  0x12   :  { %408 = vmatmul.mubr.msk.bf16.gmra.mxu0 %vm93_vm0, %v432_v8  ;;  %416 = vmatmul.mubr.msk.bf16.gmra.mxu1 %vm93_vm0, %v433_v9 }
  0xca   :  { %v405_v16 = vpop.f32.mrf.mxu0  ;;  %v413_v17 = vpop.f32.mrf.mxu1 }
  0xcc   :  { %v152_v18 = vpop.f32.mrf.mxu0  ;;  %v184_v19 = vpop.f32.mrf.mxu1 }
  0xce   :  { %v406_v21 = vpop.f32.mrf.mxu0  ;;  %v414_v22 = vpop.f32.mrf.mxu1 }
  0xcf   :  { %v216_v23 = vpack.c.bf16 %v406_v21, %v405_v16  ;;  %v220_v24 = vpack.c.bf16 %v414_v22, %v413_v17 }
  0xd0   :  { %v155_v25 = vpop.f32.mrf.mxu0  ;;  %v187_v26 = vpop.f32.mrf.mxu1 }
  0xd1   :  { %v531_v27 = vadd.bf16 %v230_v20, %v216_v23  ;;  %v533_v28 = vadd.bf16 %v230_v20, %v220_v24  ;;  %v215_v29 = vpack.c.bf16 %v155_v25, %v152_v18  ;;  %v219_v30 = vpack.c.bf16 %v187_v26, %v184_v19 }
  0xd2   :  { %v409_v31 = vpop.f32.mrf.mxu0  ;;  %v417_v32 = vpop.f32.mrf.mxu1 }
  0xd3   :  { %v382_v33 = vmul.bf16 3216621497, %v531_v27  ;;  %v386_v34 = vmul.bf16 3216621497, %v533_v28  ;;  %v537_v35 = vadd.bf16 %v230_v20, %v215_v29  ;;  %v539_v36 = vadd.bf16 %v230_v20, %v219_v30 }
  0xd4   :  { %v168_v37 = vpop.f32.mrf.mxu0  ;;  %v200_v38 = vpop.f32.mrf.mxu1 }
  0xd5   :  { %434 = vpow.bf16 %v382_v33  ;;  %v381_v39 = vmul.bf16 3216621497, %v537_v35  ;;  %v385_v40 = vmul.bf16 3216621497, %v539_v36 }
  0xd6   :  { %436 = vpow.bf16 %v386_v34  ;;  %v410_v41 = vpop.f32.mrf.mxu0  ;;  %v418_v42 = vpop.f32.mrf.mxu1 }
  0xd7   :  { %438 = vpow.bf16 %v381_v39  ;;  %v218_v43 = vpack.c.bf16 %v410_v41, %v409_v31  ;;  %v222_v44 = vpack.c.bf16 %v418_v42, %v417_v32 }
  0xd8   :  { %440 = vpow.bf16 %v385_v40  ;;  %v171_v45 = vpop.f32.mrf.mxu0  ;;  %v203_v46 = vpop.f32.mrf.mxu1 }
  0xd9   :  { %v543_v47 = vadd.bf16 %v230_v20, %v218_v43  ;;  %v545_v48 = vadd.bf16 %v230_v20, %v222_v44  ;;  %v217_v49 = vpack.c.bf16 %v171_v45, %v168_v37  ;;  %v221_v50 = vpack.c.bf16 %v203_v46, %v200_v38 }
  0xdb   :  { %v384_v51 = vmul.bf16 3216621497, %v543_v47  ;;  %v388_v52 = vmul.bf16 3216621497, %v545_v48  ;;  %v549_v53 = vadd.bf16 %v230_v20, %v217_v49  ;;  %v551_v54 = vadd.bf16 %v230_v20, %v221_v50 }
  0xdd   :  { %442 = vpow.bf16 %v384_v51  ;;  %v383_v55 = vmul.bf16 3216621497, %v549_v53  ;;  %v387_v56 = vmul.bf16 3216621497, %v551_v54 }
  0xde   :  { %444 = vpow.bf16 %v388_v52 }
  0xdf   :  { %446 = vpow.bf16 %v383_v55 }
  0xe0   :  { %448 = vpow.bf16 %v387_v56 }
  0xe3   :  { %v435_v57 = vpop.eup %434 }
  0xe4   :  { %v437_v58 = vpop.eup %436  ;;  %v272_v59 = vadd.bf16 1065369472, %v435_v57 }
  0xe5   :  { %v439_v60 = vpop.eup %438  ;;  %v276_v61 = vadd.bf16 1065369472, %v437_v58 }
  0xe6   :  { %v441_v62 = vpop.eup %440  ;;  %450 = vrcp.bf16 %v272_v59  ;;  %v271_v63 = vadd.bf16 1065369472, %v439_v60 }
  0xe7   :  { %452 = vrcp.bf16 %v276_v61  ;;  %v275_v0 = vadd.bf16 1065369472, %v441_v62 }
  0xe8   :  { %454 = vrcp.bf16 %v271_v63 }
  0xe9   :  { %456 = vrcp.bf16 %v275_v0 }
  0xeb   :  { %v443_v1 = vpop.eup %442 }
  0xec   :  { %v445_v2 = vpop.eup %444  ;;  %v274_v3 = vadd.bf16 1065369472, %v443_v1 }
  0xed   :  { %v447_v4 = vpop.eup %446  ;;  %v278_v5 = vadd.bf16 1065369472, %v445_v2 }
  0xee   :  { %v449_v6 = vpop.eup %448  ;;  %458 = vrcp.bf16 %v274_v3  ;;  %v273_v7 = vadd.bf16 1065369472, %v447_v4 }
  0xef   :  { %460 = vrcp.bf16 %v278_v5  ;;  %v277_v8 = vadd.bf16 1065369472, %v449_v6 }
  0xf0   :  { %462 = vrcp.bf16 %v273_v7 }
  0xf1   :  { %464 = vrcp.bf16 %v277_v8 }
  0xf4   :  { %v451_v9 = vpop.eup %450 }
  0xf5   :  { %v453_v10 = vpop.eup %452  ;;  %v282_v11 = vmul.bf16 1065369472, %v451_v9 }
  0xf6   :  { %v455_v12 = vpop.eup %454  ;;  %v290_v13 = vmul.bf16 1065369472, %v453_v10  ;;  %v303_v10 = vld [vmem:[%s577_s3] sm:$0x3] }
  0xf7   :  { %v457_v14 = vpop.eup %456  ;;  %v280_v15 = vmul.bf16 1065369472, %v455_v12  ;;  %v296_v17 = vmul.bf16 %v282_v11, %v531_v27 }
  0xf8   :  { %v288_v16 = vmul.bf16 1065369472, %v457_v14  ;;  %v300_v19 = vmul.bf16 %v290_v13, %v533_v28 }
  0xf9   :  { %v295_v18 = vmul.bf16 %v280_v15, %v537_v35  ;;  %v306_v29 = vunpack.c.l.bf16 %v296_v17  ;;  %v307_v40 = vunpack.c.h.bf16 %v296_v17 }
  0xfa   :  { %v299_v20 = vmul.bf16 %v288_v16, %v539_v36  ;;  %v314_v32 = vunpack.c.l.bf16 %v300_v19  ;;  %v315_v41 = vunpack.c.h.bf16 %v300_v19 }
  0xfb   :  { %v304_v21 = vunpack.c.l.bf16 %v295_v18  ;;  %v305_v22 = vunpack.c.h.bf16 %v295_v18 }
  0xfc   :  { %v459_v23 = vpop.eup %458  ;;  %v312_v24 = vunpack.c.l.bf16 %v299_v20  ;;  %v313_v25 = vunpack.c.h.bf16 %v299_v20 }
  0xfd   :  { %v461_v26 = vpop.eup %460  ;;  %v320_v30 = vadd.f32 %v305_v22, %v304_v21  ;;  %v286_v27 = vmul.bf16 1065369472, %v459_v23 }
  0xfe   :  { %v463_v31 = vpop.eup %462  ;;  %v333_v33 = vadd.f32 %v313_v25, %v312_v24  ;;  %v294_v39 = vmul.bf16 1065369472, %v461_v26 }
  0xff   :  { %v465_v34 = vpop.eup %464  ;;  %v321_v37 = vadd.f32 %v320_v30, %v306_v29  ;;  %v284_v38 = vmul.bf16 1065369472, %v463_v31  ;;  %v298_v43 = vmul.bf16 %v286_v27, %v543_v47 }
 0x100   :  { %v334_v35 = vadd.f32 %v333_v33, %v314_v32  ;;  %v292_v28 = vmul.bf16 1065369472, %v465_v34  ;;  %v302_v46 = vmul.bf16 %v294_v39, %v545_v48 }
 0x101   :  { %v297_v36 = vmul.bf16 %v284_v38, %v549_v53  ;;  %v322_v45 = vadd.f32 %v321_v37, %v307_v40  ;;  %v310_v57 = vunpack.c.l.bf16 %v298_v43  ;;  %v311_v53 = vunpack.c.h.bf16 %v298_v43 }
 0x102   :  { %v301_v42 = vmul.bf16 %v292_v28, %v551_v54  ;;  %v335_v50 = vadd.f32 %v334_v35, %v315_v41  ;;  %v318_v59 = vunpack.c.l.bf16 %v302_v46  ;;  %v319_v62 = vunpack.c.h.bf16 %v302_v46 }
 0x103   :  { %v308_v44 = vunpack.c.l.bf16 %v297_v36  ;;  %v309_v51 = vunpack.c.h.bf16 %v297_v36 }
 0x104   :  { %v316_v49 = vunpack.c.l.bf16 %v301_v42  ;;  %v317_v55 = vunpack.c.h.bf16 %v301_v42 }
 0x105   :  { %v323_v52 = vadd.f32 %v322_v45, %v308_v44 }
 0x106   :  { %v336_v56 = vadd.f32 %v335_v50, %v316_v49 }
 0x107   :  { %v324_v58 = vadd.f32 %v323_v52, %v309_v51 }
 0x108   :  { %v337_v60 = vadd.f32 %v336_v56, %v317_v55 }
 0x109   :  { %v325_v61 = vadd.f32 %v324_v58, %v310_v57 }
 0x10a   :  { %v338_v54 = vadd.f32 %v337_v60, %v318_v59 }
 0x10b   :  { %v326_v63 = vadd.f32 %v325_v61, %v311_v53 }
 0x10c   :  { %v339_v47 = vadd.f32 %v338_v54, %v319_v62 }
 0x10d   :  { %v327_v0 = vrot.slane %v326_v63, 4 }
 0x10e   :  { %v340_v1 = vrot.slane %v339_v47, 4 }
 0x10f   :  { %v328_v2 = vadd.f32 %v327_v0, %v326_v63 }
 0x110   :  { %v341_v48 = vadd.f32 %v340_v1, %v339_v47 }
 0x111   :  { %v329_v3 = vrot.slane %v328_v2, 2 }
 0x112   :  { %v342_v4 = vrot.slane %v341_v48, 2 }
 0x113   :  { %v330_v5 = vadd.f32 %v329_v3, %v328_v2 }
 0x114   :  { %v343_v6 = vadd.f32 %v342_v4, %v341_v48 }
 0x115   :  { %v331_v7 = vrot.slane %v330_v5, 1 }
 0x116   :  { %v344_v8 = vrot.slane %v343_v6, 1 }
 0x117   :  { %v332_v9 = vadd.f32 %v331_v7, %v330_v5 }
 0x118   :  { %v345_v11 = vadd.f32 %v344_v8, %v343_v6 }
 0x11a   :  { %v349_v12 = vsel %vm348_vm1, %v345_v11, %v332_v9 }
 0x11b   :  { %v351_v13 = vadd.f32 %v349_v12, %v303_v10 }
 0x11d   :  { %352 = vst [vmem:[%s577_s3] sm:$0x3] %v351_v13 }
 0x124   :  { %v356_v14 = vld [vmem:[%s577_s3] sm:$0x3] }
 0x125   :  { %v357_v15 = vmul.f32 0.015625, %v356_v14 }
 0x127   :  { %358 = vst [vmem:[%s577_s3] sm:$0x3] %v357_v15 }

// kernel: base_model_forward.3
= control target key start
LH: loop header
LB: loop body
LE: loop exit
PB: predicated region body
PF: predicated region fallthrough
CT: control target
= control target key end

     0   :  { %v1633_v8 = vmov 0   ;;  %s2091_s0 = inlined_call_operand.vmem [shape: f32[2,128], index: 0, kind: input, shape index: {}]   ;;  %s2092_s1 = inlined_call_operand.vmem [shape: bf16[128,1024], index: 1, kind: input, shape index: {}]   ;;  %s2093_s2 = inlined_call_operand.vmem [shape: f32[1,1024], index: 2, kind: input, shape index: {}]   ;;  %s2094_s3 = inlined_call_operand.vmem [shape: bf16[1024,10], index: 3, kind: input, shape index: {}]   ;;  %s2095_s4 = inlined_call_operand.vmem [shape: f32[1,10], index: 4, kind: input, shape index: {}]   ;;  %s2096_s5 = inlined_call_operand.hbm [shape: f32[2,10], index: 5, kind: output, shape index: {}]  }
   0x1   :  { %v80_v0 = vld [vmem:[%s2092_s1 + $0x1c0] sm:$0xff]  ;;  %v81_v2 = vld [vmem:[%s2092_s1 + $0x1c8] sm:$0xff]  ;;  %482 = vmatprep.mubr.bf16.mxu0 %v1633_v8  ;;  %523 = vmatprep.mubr.bf16.mxu1 %v1633_v8  ;;  %v82_v60 = vld [vmem:[%s2092_s1 + $0x1d0] sm:$0xff] }
   0x2   :  { %v84_v1 = vld [vmem:[%s2092_s1 + $0x1e0] sm:$0xff]  ;;  %v85_v4 = vld [vmem:[%s2092_s1 + $0x1e8] sm:$0xff]  ;;  %v86_v63 = vld [vmem:[%s2092_s1 + $0x1f0] sm:$0xff] }
   0x3   :  { %v1380_v3 = vcombine.high %v80_v0, %v84_v1  ;;  %v1379_v5 = vcombine.low %v80_v0, %v84_v1  ;;  %v72_v6 = vld [vmem:[%s2092_s1 + $0x180] sm:$0xff]  ;;  %v1382_v9 = vcombine.high %v81_v2, %v85_v4  ;;  %v1381_v10 = vcombine.low %v81_v2, %v85_v4  ;;  %v73_v12 = vld [vmem:[%s2092_s1 + $0x188] sm:$0xff]  ;;  %v83_v2 = vld [vmem:[%s2092_s1 + $0x1d8] sm:$0xff] }
   0x4   :  { %v76_v7 = vld [vmem:[%s2092_s1 + $0x1a0] sm:$0xff]  ;;  %v77_v13 = vld [vmem:[%s2092_s1 + $0x1a8] sm:$0xff] }
   0x5   :  { %v1372_v11 = vcombine.high %v72_v6, %v76_v7  ;;  %v64_v14 = vld [vmem:[%s2092_s1 + $0x140] sm:$0xff]  ;;  %450 = vmatprep.subr.bf16.mxu0 %v1380_v3  ;;  %v1374_v15 = vcombine.high %v73_v12, %v77_v13  ;;  %v65_v17 = vld [vmem:[%s2092_s1 + $0x148] sm:$0xff]  ;;  %491 = vmatprep.subr.bf16.mxu1 %v1382_v9  ;;  %v1371_v19 = vcombine.low %v72_v6, %v76_v7  ;;  %v87_v3 = vld [vmem:[%s2092_s1 + $0x1f8] sm:$0xff] }
   0x6   :  { %v68_v16 = vld [vmem:[%s2092_s1 + $0x160] sm:$0xff]  ;;  %v69_v18 = vld [vmem:[%s2092_s1 + $0x168] sm:$0xff]  ;;  %451 = vmatpush1.bf16.msra.mxu0 %v1379_v5  ;;  %492 = vmatpush1.bf16.msra.mxu1 %v1381_v10  ;;  %v1373_v20 = vcombine.low %v73_v12, %v77_v13  ;;  %v74_v5 = vld [vmem:[%s2092_s1 + $0x190] sm:$0xff]  ;;  %v1384_v7 = vcombine.high %v82_v60, %v86_v63  ;;  %v1386_v10 = vcombine.high %v83_v2, %v87_v3 }
   0x7   :  { %452 = vmatprep.subr.bf16.mxu0 %v1372_v11  ;;  %v1364_v21 = vcombine.high %v64_v14, %v68_v16  ;;  %493 = vmatprep.subr.bf16.mxu1 %v1374_v15  ;;  %v1366_v22 = vcombine.high %v65_v17, %v69_v18  ;;  %v56_v23 = vld [vmem:[%s2092_s1 + $0x100] sm:$0xff]  ;;  %v57_v25 = vld [vmem:[%s2092_s1 + $0x108] sm:$0xff]  ;;  %v1363_v27 = vcombine.low %v64_v14, %v68_v16  ;;  %v78_v9 = vld [vmem:[%s2092_s1 + $0x1b0] sm:$0xff] }
   0x8   :  { %v60_v24 = vld [vmem:[%s2092_s1 + $0x120] sm:$0xff]  ;;  %v61_v26 = vld [vmem:[%s2092_s1 + $0x128] sm:$0xff]  ;;  %v1365_v28 = vcombine.low %v65_v17, %v69_v18  ;;  %v75_v11 = vld [vmem:[%s2092_s1 + $0x198] sm:$0xff]  ;;  %v1383_v14 = vcombine.low %v82_v60, %v86_v63  ;;  %v1385_v16 = vcombine.low %v83_v2, %v87_v3  ;;  %v1376_v17 = vcombine.high %v74_v5, %v78_v9 }
   0x9   :  { %v1356_v29 = vcombine.high %v56_v23, %v60_v24  ;;  %v1358_v30 = vcombine.high %v57_v25, %v61_v26  ;;  %v48_v31 = vld [vmem:[%s2092_s1 + $0xc0] sm:$0xff]  ;;  %v49_v33 = vld [vmem:[%s2092_s1 + $0xc8] sm:$0xff]  ;;  %v1355_v35 = vcombine.low %v56_v23, %v60_v24  ;;  %v1357_v36 = vcombine.low %v57_v25, %v61_v26  ;;  %v79_v13 = vld [vmem:[%s2092_s1 + $0x1b8] sm:$0xff] }
   0xa   :  { %453 = vmatpush1.bf16.msra.mxu0 %v1371_v19  ;;  %494 = vmatpush1.bf16.msra.mxu1 %v1373_v20  ;;  %v52_v32 = vld [vmem:[%s2092_s1 + $0xe0] sm:$0xff]  ;;  %v53_v34 = vld [vmem:[%s2092_s1 + $0xe8] sm:$0xff]  ;;  %v66_v15 = vld [vmem:[%s2092_s1 + $0x150] sm:$0xff]  ;;  %v1378_v19 = vcombine.high %v75_v11, %v79_v13  ;;  %v1377_v24 = vcombine.low %v75_v11, %v79_v13 }
   0xb   :  { %454 = vmatprep.subr.bf16.mxu0 %v1364_v21  ;;  %495 = vmatprep.subr.bf16.mxu1 %v1366_v22  ;;  %v1348_v37 = vcombine.high %v48_v31, %v52_v32  ;;  %v1350_v38 = vcombine.high %v49_v33, %v53_v34  ;;  %v40_v39 = vld [vmem:[%s2092_s1 + $0x80] sm:$0xff]  ;;  %v41_v41 = vld [vmem:[%s2092_s1 + $0x88] sm:$0xff]  ;;  %v1347_v43 = vcombine.low %v48_v31, %v52_v32  ;;  %v70_v18 = vld [vmem:[%s2092_s1 + $0x170] sm:$0xff] }
   0xc   :  { %v44_v40 = vld [vmem:[%s2092_s1 + $0xa0] sm:$0xff]  ;;  %v45_v42 = vld [vmem:[%s2092_s1 + $0xa8] sm:$0xff]  ;;  %v1349_v44 = vcombine.low %v49_v33, %v53_v34  ;;  %v67_v20 = vld [vmem:[%s2092_s1 + $0x158] sm:$0xff]  ;;  %v1375_v22 = vcombine.low %v74_v5, %v78_v9  ;;  %v1368_v25 = vcombine.high %v66_v15, %v70_v18 }
   0xd   :  { %v1340_v45 = vcombine.high %v40_v39, %v44_v40  ;;  %v1342_v46 = vcombine.high %v41_v41, %v45_v42  ;;  %v32_v47 = vld [vmem:[%s2092_s1 + $0x40] sm:$0xff]  ;;  %v33_v49 = vld [vmem:[%s2092_s1 + $0x48] sm:$0xff]  ;;  %v1339_v51 = vcombine.low %v40_v39, %v44_v40  ;;  %v1341_v52 = vcombine.low %v41_v41, %v45_v42  ;;  %v71_v21 = vld [vmem:[%s2092_s1 + $0x178] sm:$0xff] }
   0xe   :  { %455 = vmatpush1.bf16.msra.mxu0 %v1363_v27  ;;  %496 = vmatpush1.bf16.msra.mxu1 %v1365_v28  ;;  %v36_v48 = vld [vmem:[%s2092_s1 + $0x60] sm:$0xff]  ;;  %v37_v50 = vld [vmem:[%s2092_s1 + $0x68] sm:$0xff]  ;;  %v58_v23 = vld [vmem:[%s2092_s1 + $0x110] sm:$0xff]  ;;  %v1370_v27 = vcombine.high %v67_v20, %v71_v21  ;;  %v1369_v32 = vcombine.low %v67_v20, %v71_v21 }
   0xf   :  { %456 = vmatprep.subr.bf16.mxu0 %v1356_v29  ;;  %497 = vmatprep.subr.bf16.mxu1 %v1358_v30  ;;  %v1332_v53 = vcombine.high %v32_v47, %v36_v48  ;;  %v24_v54 = vld [vmem:[%s2092_s1] sm:$0xff]  ;;  %v1334_v56 = vcombine.high %v33_v49, %v37_v50  ;;  %v25_v57 = vld [vmem:[%s2092_s1 + $0x8] sm:$0xff]  ;;  %v1331_v59 = vcombine.low %v32_v47, %v36_v48  ;;  %v62_v26 = vld [vmem:[%s2092_s1 + $0x130] sm:$0xff] }
  0x10   :  { %v28_v55 = vld [vmem:[%s2092_s1 + $0x20] sm:$0xff]  ;;  %v29_v58 = vld [vmem:[%s2092_s1 + $0x28] sm:$0xff]  ;;  %v1333_v61 = vcombine.low %v33_v49, %v37_v50  ;;  %v59_v28 = vld [vmem:[%s2092_s1 + $0x118] sm:$0xff]  ;;  %v1367_v30 = vcombine.low %v66_v15, %v70_v18  ;;  %v1360_v33 = vcombine.high %v58_v23, %v62_v26 }
  0x11   :  { %v1324_v62 = vcombine.high %v24_v54, %v28_v55  ;;  %v1326_v0 = vcombine.high %v25_v57, %v29_v58  ;;  %v22_v1 = vld [vmem:[%s2091_s0] sm:$0x3]  ;;  %v1323_v4 = vcombine.low %v24_v54, %v28_v55  ;;  %v1325_v6 = vcombine.low %v25_v57, %v29_v58  ;;  %v63_v29 = vld [vmem:[%s2092_s1 + $0x138] sm:$0xff]  ;;  %v50_v31 = vld [vmem:[%s2092_s1 + $0xd0] sm:$0xff] }
  0x12   :  { %457 = vmatpush1.bf16.msra.mxu0 %v1355_v35  ;;  %498 = vmatpush1.bf16.msra.mxu1 %v1357_v36  ;;  %v1787_v12 = vpack.c.bf16 %v22_v1, %v22_v1  ;;  %v54_v34 = vld [vmem:[%s2092_s1 + $0xf0] sm:$0xff]  ;;  %v1362_v35 = vcombine.high %v59_v28, %v63_v29  ;;  %v55_v36 = vld [vmem:[%s2092_s1 + $0xf8] sm:$0xff]  ;;  %v1361_v40 = vcombine.low %v59_v28, %v63_v29  ;;  %v1551_v13 = vld [vmem:[%s2094_s3 + $0x68] sm:$0xff]  }
  0x13   :  { %458 = vmatprep.subr.bf16.mxu0 %v1348_v37  ;;  %499 = vmatprep.subr.bf16.mxu1 %v1350_v38  ;;  %v1359_v37 = vcombine.low %v58_v23, %v62_v26  ;;  %v42_v38 = vld [vmem:[%s2092_s1 + $0x90] sm:$0xff]  ;;  %v1352_v41 = vcombine.high %v50_v31, %v54_v34  ;;  %v43_v42 = vld [vmem:[%s2092_s1 + $0x98] sm:$0xff]  ;;  %v1553_v15 = vld [vmem:[%s2094_s3 + $0x28] sm:$0xff]  }
  0x14   :  { %v46_v39 = vld [vmem:[%s2092_s1 + $0xb0] sm:$0xff]  ;;  %v35_v50 = vld [vmem:[%s2092_s1 + $0x58] sm:$0xff] }
  0x15   :  { %v38_v47 = vld [vmem:[%s2092_s1 + $0x70] sm:$0xff]  ;;  %v1344_v49 = vcombine.high %v42_v38, %v46_v39  ;;  %v27_v58 = vld [vmem:[%s2092_s1 + $0x18] sm:$0xff] }
  0x16   :  { %459 = vmatpush1.bf16.msra.mxu0 %v1347_v43  ;;  %500 = vmatpush1.bf16.msra.mxu1 %v1349_v44  ;;  %v47_v43 = vld [vmem:[%s2092_s1 + $0xb8] sm:$0xff]  ;;  %v26_v54 = vld [vmem:[%s2092_s1 + $0x10] sm:$0xff] }
  0x17   :  { %460 = vmatprep.subr.bf16.mxu0 %v1340_v45  ;;  %501 = vmatprep.subr.bf16.mxu1 %v1342_v46  ;;  %v1351_v45 = vcombine.low %v50_v31, %v54_v34  ;;  %v34_v46 = vld [vmem:[%s2092_s1 + $0x50] sm:$0xff]  ;;  %v1543_v1 = vld [vmem:[%s2094_s3 + $0x78] sm:$0xff]  }
  0x18   :  { %v30_v55 = vld [vmem:[%s2092_s1 + $0x30] sm:$0xff]  ;;  %v1336_v57 = vcombine.high %v34_v46, %v38_v47  ;;  %v1544_v3 = vld [vmem:[%s2094_s3 + $0xf8] sm:$0xff]  }
  0x19   :  { %v1328_v63 = vcombine.high %v26_v54, %v30_v55  ;;  %v1327_v2 = vcombine.low %v26_v54, %v30_v55  ;;  %v1545_v5 = vld [vmem:[%s2094_s3 + $0x38] sm:$0xff]   ;;  %v1548_v9 = vld [vmem:[%s2094_s3 + $0xf0] sm:$0xff]  }
  0x1a   :  { %461 = vmatpush1.bf16.msra.mxu0 %v1339_v51  ;;  %502 = vmatpush1.bf16.msra.mxu1 %v1341_v52  ;;  %v39_v51 = vld [vmem:[%s2092_s1 + $0x78] sm:$0xff]  ;;  %v1346_v52 = vcombine.high %v43_v42, %v47_v43  ;;  %v1550_v11 = vld [vmem:[%s2094_s3 + $0xb0] sm:$0xff]  }
  0x1b   :  { %462 = vmatprep.subr.bf16.mxu0 %v1332_v53  ;;  %503 = vmatprep.subr.bf16.mxu1 %v1334_v56  ;;  %v1343_v53 = vcombine.low %v42_v38, %v46_v39  ;;  %v1345_v56 = vcombine.low %v43_v42, %v47_v43  ;;  %v1338_v60 = vcombine.high %v35_v50, %v39_v51 }
  0x1e   :  { %463 = vmatpush1.bf16.msra.mxu0 %v1331_v59  ;;  %504 = vmatpush1.bf16.msra.mxu1 %v1333_v61  ;;  %v31_v59 = vld [vmem:[%s2092_s1 + $0x38] sm:$0xff]  ;;  %v1335_v61 = vcombine.low %v34_v46, %v38_v47 }
  0x1f   :  { %464 = vmatprep.subr.bf16.mxu0 %v1324_v62  ;;  %505 = vmatprep.subr.bf16.mxu1 %v1326_v0  ;;  %v1337_v62 = vcombine.low %v35_v50, %v39_v51  ;;  %v1330_v0 = vcombine.high %v27_v58, %v31_v59 }
  0x22   :  { %465 = vmatpush1.bf16.msra.mxu0 %v1323_v4  ;;  %506 = vmatpush1.bf16.msra.mxu1 %v1325_v6  ;;  %v1329_v4 = vcombine.low %v27_v58, %v31_v59  ;;  %v1546_v6 = vld [vmem:[%s2094_s3 + $0xb8] sm:$0xff]  }
  0x23   :  { %532 = vmatprep.subr.bf16.mxu0 %v1384_v7  ;;  %573 = vmatprep.subr.bf16.mxu1 %v1386_v10  ;;  %v1547_v7 = vld [vmem:[%s2094_s3 + $0x70] sm:$0xff]  }
  0x24   :  { %v1549_v10 = vld [vmem:[%s2094_s3 + $0x30] sm:$0xff]  }
  0x25   :  { %483 = vmatmul.mubr.bf16.vlgmr.msra.gmra.mxu0 %v1787_v12  ;;  %524 = vmatmul.mubr.bf16.vlgmr.msra.gmra.mxu1 %v1787_v12 }
  0x26   :  { %533 = vmatpush1.bf16.msra.mxu0 %v1383_v14  ;;  %574 = vmatpush1.bf16.msra.mxu1 %v1385_v16  ;;  %v1552_v14 = vld [vmem:[%s2094_s3 + $0xe8] sm:$0xff]  }
  0x27   :  { %534 = vmatprep.subr.bf16.mxu0 %v1376_v17  ;;  %575 = vmatprep.subr.bf16.mxu1 %v1378_v19 }
  0x28   :  { %564 = vmatprep.mubr.bf16.mxu0 %v1633_v8  ;;  %605 = vmatprep.mubr.bf16.mxu1 %v1633_v8  ;;  %v51_v8 = vld [vmem:[%s2092_s1 + $0xd8] sm:$0xff] }
  0x29   :  { %v1354_v44 = vcombine.high %v51_v8, %v55_v36  ;;  %v1353_v48 = vcombine.low %v51_v8, %v55_v36 }
  0x2a   :  { %535 = vmatpush1.bf16.msra.mxu0 %v1375_v22  ;;  %576 = vmatpush1.bf16.msra.mxu1 %v1377_v24 }
  0x2b   :  { %536 = vmatprep.subr.bf16.mxu0 %v1368_v25  ;;  %577 = vmatprep.subr.bf16.mxu1 %v1370_v27 }
  0x2e   :  { %537 = vmatpush1.bf16.msra.mxu0 %v1367_v30  ;;  %578 = vmatpush1.bf16.msra.mxu1 %v1369_v32 }
  0x2f   :  { %538 = vmatprep.subr.bf16.mxu0 %v1360_v33  ;;  %579 = vmatprep.subr.bf16.mxu1 %v1362_v35 }
  0x32   :  { %539 = vmatpush1.bf16.msra.mxu0 %v1359_v37  ;;  %580 = vmatpush1.bf16.msra.mxu1 %v1361_v40 }
  0x33   :  { %540 = vmatprep.subr.bf16.mxu0 %v1352_v41  ;;  %581 = vmatprep.subr.bf16.mxu1 %v1354_v44 }
  0x36   :  { %541 = vmatpush1.bf16.msra.mxu0 %v1351_v45  ;;  %582 = vmatpush1.bf16.msra.mxu1 %v1353_v48 }
  0x37   :  { %542 = vmatprep.subr.bf16.mxu0 %v1344_v49  ;;  %583 = vmatprep.subr.bf16.mxu1 %v1346_v52 }
  0x3a   :  { %543 = vmatpush1.bf16.msra.mxu0 %v1343_v53  ;;  %584 = vmatpush1.bf16.msra.mxu1 %v1345_v56 }
  0x3b   :  { %544 = vmatprep.subr.bf16.mxu0 %v1336_v57  ;;  %585 = vmatprep.subr.bf16.mxu1 %v1338_v60 }
  0x3e   :  { %545 = vmatpush1.bf16.msra.mxu0 %v1335_v61  ;;  %586 = vmatpush1.bf16.msra.mxu1 %v1337_v62 }
  0x3f   :  { %546 = vmatprep.subr.bf16.mxu0 %v1328_v63  ;;  %587 = vmatprep.subr.bf16.mxu1 %v1330_v0 }
  0x42   :  { %547 = vmatpush1.bf16.msra.mxu0 %v1327_v2  ;;  %588 = vmatpush1.bf16.msra.mxu1 %v1329_v4 }
  0x43   :  { %1453 = vmatprep.subr.bf16.mxu0 %v1543_v1  ;;  %1475 = vmatprep.subr.bf16.mxu1 %v1544_v3 }
  0x45   :  { %565 = vmatmul.mubr.bf16.vlgmr.msra.gmra.mxu0 %v1787_v12  ;;  %606 = vmatmul.mubr.bf16.vlgmr.msra.gmra.mxu1 %v1787_v12 }
  0x46   :  { %1454 = vmatpush3.bf16.msra.mxu0 %v1545_v5  ;;  %1476 = vmatpush3.bf16.msra.mxu1 %v1546_v6 }
  0x47   :  { %1455 = vmatprep.subr.bf16.mxu0 %v1547_v7  ;;  %1477 = vmatprep.subr.bf16.mxu1 %v1548_v9 }
  0x4a   :  { %1456 = vmatpush3.bf16.msra.mxu0 %v1549_v10 }
  0x4b   :  { %10 = vsyncpa [#allocation3], 0  ;;  %1478 = vmatpush3.bf16.msra.mxu1 %v1550_v11  ;;  %1457 = vmatprep.subr.bf16.mxu0 %v1551_v13  ;;  %v1554_v12 = vld [vmem:[%s2094_s3 + $0xa8] sm:$0xff]   ;;  %v1555_v16 = vld [vmem:[%s2094_s3 + $0x60] sm:$0xff]   ;;  %v90_v37 = vlaneseq  ;;  %vm1307_vm0 = vcmask 74752  }
  0x4c   :  { %1479 = vmatprep.subr.bf16.mxu1 %v1552_v14  ;;  %v1556_v17 = vld [vmem:[%s2094_s3 + $0xe0] sm:$0xff]   ;;  %v1559_v20 = vld [vmem:[%s2094_s3 + $0x58] sm:$0xff]   ;;  %v1563_v24 = vld [vmem:[%s2094_s3 + $0x50] sm:$0xff]  }
  0x4d   :  { %v1557_v18 = vld [vmem:[%s2094_s3 + $0x20] sm:$0xff]   ;;  %v1560_v21 = vld [vmem:[%s2094_s3 + $0xd8] sm:$0xff]   ;;  %v1564_v25 = vld [vmem:[%s2094_s3 + $0xd0] sm:$0xff]   ;;  %v1972_v38 = vshrl.u32 %v90_v37, 7 }
  0x4e   :  { %1458 = vmatpush3.bf16.msra.mxu0 %v1553_v15  ;;  %v1558_v19 = vld [vmem:[%s2094_s3 + $0xa0] sm:$0xff]   ;;  %v1561_v22 = vld [vmem:[%s2094_s3 + $0x18] sm:$0xff]   ;;  %v1565_v26 = vld [vmem:[%s2094_s3 + $0x10] sm:$0xff]  }
  0x4f   :  { %1480 = vmatpush3.bf16.msra.mxu1 %v1554_v12  ;;  %1459 = vmatprep.subr.bf16.mxu0 %v1555_v16  ;;  %v1562_v23 = vld [vmem:[%s2094_s3 + $0x98] sm:$0xff]   ;;  %v1566_v27 = vld [vmem:[%s2094_s3 + $0x90] sm:$0xff]   ;;  %v1567_v28 = vld [vmem:[%s2094_s3 + $0x48] sm:$0xff]   ;;  %v92_v39 = vsub.s32 0, %v1972_v38  ;;  %v100_v40 = vsub.s32 2, %v1972_v38  ;;  %v96_v42 = vsub.s32 1, %v1972_v38 }
  0x50   :  { %1481 = vmatprep.subr.bf16.mxu1 %v1556_v17  ;;  %v1568_v29 = vld [vmem:[%s2094_s3 + $0xc8] sm:$0xff]   ;;  %v1571_v32 = vld [vmem:[%s2094_s3 + $0x40] sm:$0xff]   ;;  %v1575_v8 = vld [vmem:[%s2094_s3 + $0x178] sm:$0xff]   ;;  %v104_v43 = vsub.s32 3, %v1972_v38 }
  0x51   :  { %v1569_v30 = vld [vmem:[%s2094_s3 + $0x8] sm:$0xff]   ;;  %v1572_v33 = vld [vmem:[%s2094_s3 + $0xc0] sm:$0xff]   ;;  %v1576_v36 = vld [vmem:[%s2094_s3 + $0x1f8] sm:$0xff]  }
  0x52   :  { %1460 = vmatpush3.bf16.msra.mxu0 %v1557_v18  ;;  %v1570_v31 = vld [vmem:[%s2094_s3 + $0x88] sm:$0xff]   ;;  %v1573_v34 = vld [vmem:[%s2094_s3] sm:$0xff]   ;;  %v1577_v60 = vld [vmem:[%s2094_s3 + $0x138] sm:$0xff]  }
  0x53   :  { %1482 = vmatpush3.bf16.msra.mxu1 %v1558_v19  ;;  %1461 = vmatprep.subr.bf16.mxu0 %v1559_v20  ;;  %v1574_v35 = vld [vmem:[%s2094_s3 + $0x80] sm:$0xff]   ;;  %v1578_v0 = vld [vmem:[%s2094_s3 + $0x1b8] sm:$0xff]   ;;  %v1579_v1 = vld [vmem:[%s2094_s3 + $0x170] sm:$0xff]  }
  0x54   :  { %1483 = vmatprep.subr.bf16.mxu1 %v1560_v21  ;;  %v1979_v41 = vld [vmem:[%s2093_s2] sm:$0xff]  ;;  %v1580_v3 = vld [vmem:[%s2094_s3 + $0x1f0] sm:$0xff]   ;;  %v1583_v6 = vld [vmem:[%s2094_s3 + $0x168] sm:$0xff]  }
  0x55   :  { %v93_v44 = vrot.slane %v1979_v41, %v92_v39  ;;  %v101_v45 = vrot.slane %v1979_v41, %v100_v40  ;;  %v97_v46 = vrot.slane %v1979_v41, %v96_v42  ;;  %v105_v48 = vrot.slane %v1979_v41, %v104_v43  ;;  %v1581_v4 = vld [vmem:[%s2094_s3 + $0x130] sm:$0xff]   ;;  %v1584_v7 = vld [vmem:[%s2094_s3 + $0x1e8] sm:$0xff]   ;;  %v1587_v11 = vld [vmem:[%s2094_s3 + $0x160] sm:$0xff]  }
  0x56   :  { %1462 = vmatpush3.bf16.msra.mxu0 %v1561_v22  ;;  %v1582_v5 = vld [vmem:[%s2094_s3 + $0x1b0] sm:$0xff]   ;;  %v1585_v9 = vld [vmem:[%s2094_s3 + $0x128] sm:$0xff]   ;;  %v1588_v13 = vld [vmem:[%s2094_s3 + $0x1e0] sm:$0xff]  }
  0x57   :  { %1484 = vmatpush3.bf16.msra.mxu1 %v1562_v23  ;;  %1463 = vmatprep.subr.bf16.mxu0 %v1563_v24  ;;  %v1586_v10 = vld [vmem:[%s2094_s3 + $0x1a8] sm:$0xff]   ;;  %v1589_v14 = vld [vmem:[%s2094_s3 + $0x120] sm:$0xff]   ;;  %v1591_v12 = vld [vmem:[%s2094_s3 + $0x158] sm:$0xff]   ;;  %v108_v23 = vsub.s32 4, %v1972_v38  ;;  %v116_v24 = vsub.s32 6, %v1972_v38 }
  0x58   :  { %1485 = vmatprep.subr.bf16.mxu1 %v1564_v25  ;;  %v1590_v15 = vld [vmem:[%s2094_s3 + $0x1a0] sm:$0xff]   ;;  %v1592_v16 = vld [vmem:[%s2094_s3 + $0x1d8] sm:$0xff]   ;;  %v1595_v19 = vld [vmem:[%s2094_s3 + $0x150] sm:$0xff]  }
  0x59   :  { %v1593_v17 = vld [vmem:[%s2094_s3 + $0x118] sm:$0xff]   ;;  %v1596_v20 = vld [vmem:[%s2094_s3 + $0x1d0] sm:$0xff]   ;;  %v1599_v25 = vld [vmem:[%s2094_s3 + $0x148] sm:$0xff]  }
  0x5a   :  { %1464 = vmatpush3.bf16.msra.mxu0 %v1565_v26  ;;  %v1594_v18 = vld [vmem:[%s2094_s3 + $0x198] sm:$0xff]   ;;  %v1597_v21 = vld [vmem:[%s2094_s3 + $0x110] sm:$0xff]   ;;  %v1600_v26 = vld [vmem:[%s2094_s3 + $0x1c8] sm:$0xff]  }
  0x5b   :  { %1486 = vmatpush3.bf16.msra.mxu1 %v1566_v27  ;;  %1465 = vmatprep.subr.bf16.mxu0 %v1567_v28  ;;  %v1598_v22 = vld [vmem:[%s2094_s3 + $0x190] sm:$0xff]   ;;  %v112_v27 = vsub.s32 5, %v1972_v38  ;;  %v120_v28 = vsub.s32 7, %v1972_v38  ;;  %v1605_v38 = vld [vmem:[%s2094_s3 + $0x100] sm:$0xff]  }
  0x5c   :  { %1487 = vmatprep.subr.bf16.mxu1 %v1568_v29  ;;  %v1601_v29 = vld [vmem:[%s2094_s3 + $0x108] sm:$0xff]   ;;  %v1606_v43 = vld [vmem:[%s2094_s3 + $0x180] sm:$0xff]  }
  0x5e   :  { %1466 = vmatpush3.bf16.msra.mxu0 %v1569_v30  ;;  %v109_v30 = vrot.slane %v1979_v41, %v108_v23 }
  0x5f   :  { %1488 = vmatpush3.bf16.msra.mxu1 %v1570_v31  ;;  %1467 = vmatprep.subr.bf16.mxu0 %v1571_v32  ;;  %v117_v31 = vrot.slane %v1979_v41, %v116_v24  ;;  %v1602_v32 = vld [vmem:[%s2094_s3 + $0x188] sm:$0xff]  }
  0x60   :  { %1489 = vmatprep.subr.bf16.mxu1 %v1572_v33  ;;  %v1603_v33 = vld [vmem:[%s2094_s3 + $0x140] sm:$0xff]  }
  0x62   :  { %1468 = vmatpush3.bf16.msra.mxu0 %v1573_v34  ;;  %v113_v34 = vrot.slane %v1979_v41, %v112_v27 }
  0x63   :  { %1490 = vmatpush3.bf16.msra.mxu1 %v1574_v35  ;;  %1497 = vmatprep.subr.bf16.mxu0 %v1575_v8  ;;  %v1604_v35 = vld [vmem:[%s2094_s3 + $0x1c0] sm:$0xff]  }
  0x64   :  { %1519 = vmatprep.subr.bf16.mxu1 %v1576_v36  ;;  %v121_v36 = vrot.slane %v1979_v41, %v120_v28 }
  0xe5   :  { %v484_v47 = vpop.f32.mrf.mxu0  ;;  %v525_v49 = vpop.f32.mrf.mxu1 }
  0xe6   :  { %v485_v50 = vadd.f32 %v484_v47, %v93_v44  ;;  %v526_v51 = vadd.f32 %v525_v49, %v101_v45 }
  0xe7   :  { %v486_v52 = vpop.f32.mrf.mxu0  ;;  %v527_v54 = vpop.f32.mrf.mxu1 }
  0xe8   :  { %v487_v53 = vadd.f32 %v486_v52, %v97_v46  ;;  %v528_v55 = vadd.f32 %v527_v54, %v105_v48  ;;  %v616_v57 = vpack.c.bf16 %v526_v51, %v526_v51  ;;  %v614_v61 = vpack.c.bf16 %v485_v50, %v485_v50 }
  0xe9   :  { %v488_v56 = vpop.f32.mrf.mxu0  ;;  %v529_v59 = vpop.f32.mrf.mxu1 }
  0xea   :  { %v615_v58 = vpack.c.bf16 %v487_v53, %v487_v53  ;;  %v617_v62 = vpack.c.bf16 %v528_v55, %v528_v55 }
  0xeb   :  { %v489_v63 = vpop.f32.mrf.mxu0  ;;  %v530_v2 = vpop.f32.mrf.mxu1 }
  0xec   :  { %1173 = vmatprep.mubr.bf16.mxu0 %v615_v58  ;;  %1213 = vmatprep.mubr.bf16.mxu1 %v617_v62  ;;  %v1387_v63 = vld [vmem:[%s2095_s4] ss:$0 sm:$0xff]  ;;  %s1634_s4 = smov [#allocation2]  }
  0xed   :  { %1174 = vmatmul.mubr.bf16.vlgmr.msra.gmra.mxu0 %v614_v61  ;;  %1214 = vmatmul.mubr.bf16.vlgmr.msra.gmra.mxu1 %v616_v57  ;;  %s1315_s14 = sshll.u32 %s1634_s4, 4  ;;  %s1316_s14 = int_to_ptr.vmem [resolvable:$true] %s1315_s14 }
  0xee   :  { %1498 = vmatpush3.bf16.msra.mxu0 %v1577_v60  ;;  %1520 = vmatpush3.bf16.msra.mxu1 %v1578_v0  ;;  %s1611_s15 = scalar_lea.vmem %s1316_s14, 32  ;;  %p1616_p1 = scmp.lt.s32.totalorder %s1316_s14, %s1316_s14 }
  0xef   :  { %1499 = vmatprep.subr.bf16.mxu0 %v1579_v1  ;;  %1521 = vmatprep.subr.bf16.mxu1 %v1580_v3  ;;  %p1612_p0 = scmp.ne.s32.totalorder %s1316_s14, %s1611_s15  ;;  %p1617_p2 = scmp.lt.s32.totalorder %s1611_s15, %s1611_s15 }
  0xf1   :  { %p1618_p3 = por %p1617_p2, %p1616_p1 }
  0xf2   :  { %1500 = vmatpush3.bf16.msra.mxu0 %v1581_v4  ;;  %1522 = vmatpush3.bf16.msra.mxu1 %v1582_v5 }
  0xf3   :  { %1501 = vmatprep.subr.bf16.mxu0 %v1583_v6  ;;  %1523 = vmatprep.subr.bf16.mxu1 %v1584_v7  ;;  %p1619_p4 = pnand %p1618_p3, %p1612_p0 }
  0xf6   :  { %1502 = vmatpush3.bf16.msra.mxu0 %v1585_v9  ;;  %1524 = vmatpush3.bf16.msra.mxu1 %v1586_v10 }
  0xf7   :  { %1503 = vmatprep.subr.bf16.mxu0 %v1587_v11  ;;  %1525 = vmatprep.subr.bf16.mxu1 %v1588_v13 }
  0xfa   :  { %1504 = vmatpush3.bf16.msra.mxu0 %v1589_v14  ;;  %1526 = vmatpush3.bf16.msra.mxu1 %v1590_v15 }
  0xfb   :  { %1505 = vmatprep.subr.bf16.mxu0 %v1591_v12  ;;  %1527 = vmatprep.subr.bf16.mxu1 %v1592_v16 }
  0xfe   :  { %1506 = vmatpush3.bf16.msra.mxu0 %v1593_v17  ;;  %1528 = vmatpush3.bf16.msra.mxu1 %v1594_v18 }
  0xff   :  { %1507 = vmatprep.subr.bf16.mxu0 %v1595_v19  ;;  %1529 = vmatprep.subr.bf16.mxu1 %v1596_v20 }
 0x102   :  { %1508 = vmatpush3.bf16.msra.mxu0 %v1597_v21  ;;  %1530 = vmatpush3.bf16.msra.mxu1 %v1598_v22 }
 0x103   :  { %1509 = vmatprep.subr.bf16.mxu0 %v1599_v25  ;;  %1531 = vmatprep.subr.bf16.mxu1 %v1600_v26 }
 0x105   :  { %v566_v8 = vpop.f32.mrf.mxu0  ;;  %v607_v37 = vpop.f32.mrf.mxu1 }
 0x106   :  { %1510 = vmatpush3.bf16.msra.mxu0 %v1601_v29  ;;  %v567_v39 = vadd.f32 %v566_v8, %v109_v30  ;;  %v608_v40 = vadd.f32 %v607_v37, %v117_v31  ;;  %1532 = vmatpush3.bf16.msra.mxu1 %v1602_v32 }
 0x107   :  { %v568_v42 = vpop.f32.mrf.mxu0  ;;  %1511 = vmatprep.subr.bf16.mxu0 %v1603_v33  ;;  %v609_v45 = vpop.f32.mrf.mxu1  ;;  %1533 = vmatprep.subr.bf16.mxu1 %v1604_v35 }
 0x108   :  { %v569_v44 = vadd.f32 %v568_v42, %v113_v34  ;;  %v610_v46 = vadd.f32 %v609_v45, %v121_v36  ;;  %v620_v47 = vpack.c.bf16 %v608_v40, %v608_v40  ;;  %v618_v50 = vpack.c.bf16 %v567_v39, %v567_v39 }
 0x109   :  { %v570_v41 = vpop.f32.mrf.mxu0  ;;  %v611_v49 = vpop.f32.mrf.mxu1 }
 0x10a   :  { %v619_v48 = vpack.c.bf16 %v569_v44, %v569_v44  ;;  %1512 = vmatpush3.bf16.msra.mxu0 %v1605_v38  ;;  %v621_v51 = vpack.c.bf16 %v610_v46, %v610_v46  ;;  %1534 = vmatpush3.bf16.msra.mxu1 %v1606_v43 }
 0x10b   :  { %v571_v52 = vpop.f32.mrf.mxu0  ;;  %v612_v53 = vpop.f32.mrf.mxu1 }
 0x10c   :  { %1253 = vmatprep.mubr.bf16.mxu0 %v619_v48  ;;  %1293 = vmatprep.mubr.bf16.mxu1 %v621_v51 }
 0x10d   :  { %1254 = vmatmul.mubr.bf16.vlgmr.msra.gmra.mxu0 %v618_v50  ;;  %1294 = vmatmul.mubr.bf16.vlgmr.msra.gmra.mxu1 %v620_v47 }
 0x1ad   :  { %v1469_v54 = vpop.f32.mrf.mxu0  ;;  %v1491_v55 = vpop.f32.mrf.mxu1 }
 0x1af   :  { %v1470_v56 = vpop.f32.mrf.mxu0  ;;  %v1492_v57 = vpop.f32.mrf.mxu1 }
 0x1b0   :  { %v1471_v62 = vadd.f32 %v1470_v56, %v1469_v54  ;;  %v1493_v2 = vadd.f32 %v1492_v57, %v1491_v55 }
 0x1b1   :  { %v1472_v58 = vpop.f32.mrf.mxu0  ;;  %v1494_v59 = vpop.f32.mrf.mxu1 }
 0x1b2   :  { %v1176_v0 = vadd.f32 %v1471_v62, %v1387_v63 }
 0x1b3   :  { %v1473_v60 = vpop.f32.mrf.mxu0  ;;  %v1495_v61 = vpop.f32.mrf.mxu1 }
 0x1b4   :  { %v1216_v5 = vadd.f32 %v1493_v2, %v1176_v0 }
 0x1cd   :  { %v1513_v1 = vpop.f32.mrf.mxu0  ;;  %v1535_v3 = vpop.f32.mrf.mxu1 }
 0x1cf   :  { %v1514_v4 = vpop.f32.mrf.mxu0  ;;  %v1536_v7 = vpop.f32.mrf.mxu1 }
 0x1d0   :  { %v1515_v6 = vadd.f32 %v1514_v4, %v1513_v1  ;;  %v1537_v11 = vadd.f32 %v1536_v7, %v1535_v3 }
 0x1d1   :  { %v1516_v9 = vpop.f32.mrf.mxu0  ;;  %v1538_v13 = vpop.f32.mrf.mxu1 }
 0x1d2   :  { %v1256_v10 = vadd.f32 %v1515_v6, %v1216_v5 }
 0x1d3   :  { %v1517_v14 = vpop.f32.mrf.mxu0  ;;  %v1539_v12 = vpop.f32.mrf.mxu1 }
 0x1d4   :  { %v1296_v15 = vadd.f32 %v1537_v11, %v1256_v10 }
 0x1d6   :  { %v1452_v16 = vmul.f32 -1.442695, %v1296_v15 }
 0x1d8   :  { %1607 = vpow2.f32 %v1452_v16 }
 0x1e5   :  { %v1608_v17 = vpop.eup %1607 }
 0x1e6   :  { %v1304_v18 = vadd.f32 1.0, %v1608_v17 }
 0x1e8   :  { %1609 = vrcp.f32 %v1304_v18 }
 0x1f5   :  { %v1610_v19 = vpop.eup %1609 }
 0x1f6   :  { %1308 = vst.msk [vmem:[#allocation2] sm:$0x3] %vm1307_vm0, %v1610_v19 }
 0x1f7   :  { %1622 = shalt.err (!%p1619_p4)
}
 0x1f8   :  { %1318 = dma.vmem_to_hbm [thread:$0]  %s1316_s14, 32, %s2096_s5, [#allocation3]  }
 0x1f9   :  { %1631 = dma.done.wait [#allocation3], 32  }
 0x1fa   :  { %1632 = vsyncadd [#allocation3], 4294967264 }
 0x1fb   :  { %1322 = vsyncpa [#allocation3], 1 }

</bundles_post_ra>
